<compile_context>
chip_gen: v5e
topology: v5e:2x2
jax: 0.10.0
libtpu: 0.0.40
codegen_flags: <defaults>
</compile_context>

<pallas_src>
import functools

import jax
import jax.numpy as jnp
import numpy as np
from jax.experimental import pallas as pl
from jax.experimental.pallas import tpu as pltpu

# ----------------------------- model constants ------------------------------
CAPACITY = 4              # args.capacity
LATENT = 8                # args.latent
BATCH = 2
IMG = 28                  # fc expects 2c*7*7 features -> 28x28 input
K = 4                     # conv kernel size
H2 = IMG // 2             # 14 : spatial after conv1 (stride 2, pad 1)
H3 = H2 // 2              # 7  : spatial after conv2 ( == IMG // 4 )
C1 = CAPACITY             # conv1 out channels
C2 = 2 * CAPACITY         # conv2 out channels

LW = 128                  # padded lane width of h1/h2 activation blocks
WBLK = 3 * LW             # 384: centre / prev-row / next-row output blocks
XQ_LANES = 4 * IMG        # 112: one kernel row holds 4 consecutive image rows


def _round8(v):
    return (v + 7) // 8 * 8


def _small_layout(batch):
    """Row offsets of each constant inside the packed (rows, 128) buffer."""
    n = batch * H3
    offs, total = {}, 0
    for name, rows in (("wfc", LW), ("csum", LATENT * H3), ("mask", n),
                       ("rsum", _round8(batch)), ("sdn", n), ("sup", n),
                       ("bias", 3)):
        offs[name] = total
        total += _round8(rows)
    return offs, total


# ------------------------------ fused kernel --------------------------------
def _encoder_kernel(x_ref, wbig_ref, wsml_ref, o_ref, *, batch, offs):
    f32 = jnp.float32
    n = batch * H3                      # activation rows: (b, j), j = 0..6
    nout = o_ref.shape[0]               # 8-row padded output block

    def mm(a, b):
        return jnp.dot(a, b, preferred_element_type=f32)

    # Shift matrices: output row (b,j) <- row (b,j-1) / (b,j+1), zero at the
    # per-batch block edges (this also implements the conv zero-padding in y).
    sdn = wsml_ref[offs["sdn"]:offs["sdn"] + n, 0:n]            # (n, n)
    sup = wsml_ref[offs["sup"]:offs["sup"] + n, 0:n]            # (n, n)
    bias = wsml_ref[offs["bias"]:offs["bias"] + 8, :]           # (8, 128)

    # ---- conv1 + ReLU -------------------------------------------------------
    # x_ref row (b,j) holds image rows 4j..4j+3; the banded weight produces a
    # centre block (taps in rows 4j..4j+3) and prev/next blocks (taps in rows
    # 4j-1 / 4j+4) which are routed by the shift GEMMs.
    y1 = mm(x_ref[...], wbig_ref[0:XQ_LANES, :])                # (n, 384)
    h1 = y1[:, 0:LW] + mm(sdn, y1[:, LW:2 * LW]) + mm(sup, y1[:, 2 * LW:3 * LW])
    h1 = jnp.maximum(h1 + bias[0:1, :], 0.0)                    # (n, 128)
    # h1 lane layout: pr*56 + rx*4 + c1  (ry = 2j + pr), lanes 112.. are zero.

    # ---- conv2 + ReLU -------------------------------------------------------
    y2 = mm(h1, wbig_ref[XQ_LANES:XQ_LANES + LW, :])            # (n, 384)
    h2 = y2[:, 0:LW] + mm(sdn, y2[:, LW:2 * LW]) + mm(sup, y2[:, 2 * LW:3 * LW])
    h2 = jnp.maximum(h2 + bias[1:2, :], 0.0)                    # (n, 128)
    # h2 lane layout: qx*8 + c2 for output row qy = j, lanes 56.. are zero.

    # ---- fc: out = Rsum @ ((h2 @ Wfc) * Mask) @ Csum + b --------------------
    t = mm(h2, wsml_ref[offs["wfc"]:offs["wfc"] + LW, 0:LATENT * H3])    # (n, 56)
    t = t * wsml_ref[offs["mask"]:offs["mask"] + n, 0:LATENT * H3]
    u = mm(t, wsml_ref[offs["csum"]:offs["csum"] + LATENT * H3, :])      # (n, 128)
    r = wsml_ref[offs["rsum"]:offs["rsum"] + nout, 0:n]                  # (8, n)
    o_ref[...] = mm(r, u) + bias[2:3, :]                                 # (8, 128)


def _vspec(shape):
    zero = (0,) * len(shape)
    return pl.BlockSpec(shape, lambda i, _z=zero: _z)


@jax.jit
def encoder_forward(x, wbig, wsml):
    """x: (B, 1, 28, 28) f32; wbig/wsml from prepare_params built for the same B."""
    batch = x.shape[0]
    if x.shape[1:] != (1, IMG, IMG):
        raise ValueError(f"expected (B, 1, {IMG}, {IMG}) input, got {x.shape}")
    offs, total_rows = _small_layout(batch)
    if wsml.shape != (total_rows, LW) or wbig.shape != (XQ_LANES + LW, WBLK):
        raise ValueError("packed constants were prepared for a different batch size")
    nout = _round8(batch)
    xq = x.reshape(batch * H3, XQ_LANES)        # free contiguous reshape (no im2col)
    kernel = functools.partial(_encoder_kernel, batch=batch, offs=offs)
    out = pl.pallas_call(
        kernel,
        out_shape=jax.ShapeDtypeStruct((nout, LW), jnp.float32),
        grid=(1,),
        in_specs=[_vspec(xq.shape), _vspec(wbig.shape), _vspec(wsml.shape)],
        out_specs=_vspec((nout, LW)),
        compiler_params=pltpu.CompilerParams(dimension_semantics=("arbitrary",)),
    )(xq, wbig, wsml)
    return out[:batch, :LATENT]                 # slice lane-padded output block


# ------------------------- host-side weight repack --------------------------
def prepare_params(params, batch=BATCH):
    """One-time numpy repack of PyTorch-layout weights into the two packed
    GEMM-operand buffers consumed by the fused kernel."""
    c1w = np.asarray(params["conv1_w"], np.float32)   # (C1, 1, K, K)
    c1b = np.asarray(params["conv1_b"], np.float32)
    c2w = np.asarray(params["conv2_w"], np.float32)   # (C2, C1, K, K)
    c2b = np.asarray(params["conv2_b"], np.float32)
    fcw = np.asarray(params["fc_w"], np.float32)      # (LATENT, C2*H3*H3)
    fcb = np.asarray(params["fc_b"], np.float32)

    n = batch * H3
    nout = _round8(batch)

    # conv1 banded weight: rows = xq lanes (4 image rows x 28 cols), cols =
    # three 128-lane blocks [centre | needs row j-1 | needs row j+1].
    w1 = np.zeros((XQ_LANES, WBLK), np.float32)
    for pr in range(2):                              # output row ry = 2j + pr
        for rx in range(H2):
            for co in range(C1):
                col = pr * H2 * C1 + rx * C1 + co
                for ix in range(IMG):
                    kx = ix - 2 * rx + 1
                    if not 0 <= kx < K:
                        continue                     # x zero-padding
                    for s4 in range(4):              # image row 4j + s4
                        ky = s4 - 2 * pr + 1
                        if 0 <= ky < K:
                            w1[s4 * IMG + ix, col] = c1w[co, 0, ky, kx]
                    if pr == 0:   # ky=0 tap lives in image row 4j-1 (row j-1, s4=3)
                        w1[3 * IMG + ix, LW + col] = c1w[co, 0, 0, kx]
                    else:         # ky=3 tap lives in image row 4j+4 (row j+1, s4=0)
                        w1[0 * IMG + ix, 2 * LW + col] = c1w[co, 0, 3, kx]

    # conv2 banded weight: rows = h1 lanes, cols = same three blocks.
    w2 = np.zeros((LW, WBLK), np.float32)
    for qx in range(H3):
        for co in range(C2):
            col = qx * C2 + co
            for rx in range(H2):
                kx = rx - 2 * qx + 1
                if not 0 <= kx < K:
                    continue
                for ci in range(C1):
                    lane0 = rx * C1 + ci                 # pr=0 lanes (row 2qy)
                    lane1 = H2 * C1 + rx * C1 + ci       # pr=1 lanes (row 2qy+1)
                    w2[lane0, col] = c2w[co, ci, 1, kx]            # ky=1
                    w2[lane1, col] = c2w[co, ci, 2, kx]            # ky=2
                    w2[lane1, LW + col] = c2w[co, ci, 0, kx]       # ky=0 (via j-1)
                    w2[lane0, 2 * LW + col] = c2w[co, ci, 3, kx]   # ky=3 (via j+1)

    wbig = np.concatenate([w1, w2], axis=0)              # (240, 384)

    # small constants packed into one (rows, 128) buffer
    offs, total = _small_layout(batch)
    wsml = np.zeros((total, LW), np.float32)

    f4 = fcw.reshape(LATENT, C2, H3, H3)                 # (l, c2, qy, qx)
    wfc = np.transpose(f4, (3, 1, 0, 2)).reshape(H3 * C2, LATENT * H3)
    wsml[offs["wfc"]:offs["wfc"] + H3 * C2, 0:LATENT * H3] = wfc

    csum = np.kron(np.eye(LATENT, dtype=np.float32), np.ones((H3, 1), np.float32))
    wsml[offs["csum"]:offs["csum"] + LATENT * H3, 0:LATENT] = csum

    mask = np.tile(np.eye(H3, dtype=np.float32), (batch, LATENT))        # (n, 56)
    wsml[offs["mask"]:offs["mask"] + n, 0:LATENT * H3] = mask

    rsum = np.zeros((nout, n), np.float32)
    for b in range(batch):
        rsum[b, b * H3:(b + 1) * H3] = 1.0
    wsml[offs["rsum"]:offs["rsum"] + nout, 0:n] = rsum

    sdn = np.zeros((n, n), np.float32)
    sup = np.zeros((n, n), np.float32)
    for b in range(batch):
        for j in range(H3):
            if j > 0:
                sdn[b * H3 + j, b * H3 + j - 1] = 1.0
            if j < H3 - 1:
                sup[b * H3 + j, b * H3 + j + 1] = 1.0
    wsml[offs["sdn"]:offs["sdn"] + n, 0:n] = sdn
    wsml[offs["sup"]:offs["sup"] + n, 0:n] = sup

    wsml[offs["bias"] + 0, 0:2 * H2 * C1] = np.tile(c1b, 2 * H2)   # h1 bias per lane
    wsml[offs["bias"] + 1, 0:H3 * C2] = np.tile(c2b, H3)           # h2 bias per lane
    wsml[offs["bias"] + 2, 0:LATENT] = fcb                         # fc bias

    return dict(wbig=jnp.asarray(wbig), wsml=jnp.asarray(wsml))


# ----------------------------- params / reference ---------------------------
def init_params(key, capacity=CAPACITY, latent=LATENT):
    c = capacity
    ks = jax.random.split(key, 6)

    def u(k, shape, fan_in):
        bound = 1.0 / np.sqrt(fan_in)
        return jax.random.uniform(k, shape, jnp.float32, -bound, bound)

    return dict(
        conv1_w=u(ks[0], (c, 1, K, K), 1 * K * K),
        conv1_b=u(ks[1], (c,), 1 * K * K),
        conv2_w=u(ks[2], (2 * c, c, K, K), c * K * K),
        conv2_b=u(ks[3], (2 * c,), c * K * K),
        fc_w=u(ks[4], (latent, 2 * c * H3 * H3), 2 * c * H3 * H3),
        fc_b=u(ks[5], (latent,), 2 * c * H3 * H3),
    )


def _conv_ref(x, w, b):
    y = jax.lax.conv_general_dilated(
        x, w, window_strides=(2, 2), padding=[(1, 1), (1, 1)],
        dimension_numbers=("NCHW", "OIHW", "NCHW"))
    return y + b[None, :, None, None]


def encoder_ref(x, params):
    h = jax.nn.relu(_conv_ref(x, params["conv1_w"], params["conv1_b"]))
    h = jax.nn.relu(_conv_ref(h, params["conv2_w"], params["conv2_b"]))
    h = h.reshape(x.shape[0], -1)                      # torch .view order (C, H, W)
    return h @ params["fc_w"].T + params["fc_b"]


# ----------------------------------- main ------------------------------------
if __name__ == "__main__":
    key = jax.random.PRNGKey(0)
    pkey, xkey = jax.random.split(key)
    params = init_params(pkey)
    prep = prepare_params(params, batch=BATCH)
    x = jax.random.normal(xkey, (BATCH, 1, IMG, IMG), jnp.float32)

    out = jax.block_until_ready(encoder_forward(x, prep["wbig"], prep["wsml"]))
    ref = jax.block_until_ready(encoder_ref(x, params))

    assert out.shape == (BATCH, LATENT), out.shape
    out_np, ref_np = np.asarray(out), np.asarray(ref)
    if not np.allclose(out_np, ref_np, atol=1e-2, rtol=1e-2):
        err = float(np.max(np.abs(out_np - ref_np)))
        raise AssertionError(f"mismatch vs reference, max abs err {err:e}")
    print("KERNEL_OK")
</pallas_src>

<mosaic_0001>
module attributes {stable_mosaic.version = 11 : i64} {
  func.func @_encoder_kernel(%arg0: i32, %arg1: memref<14x112xf32, #tpu.memory_space<vmem>>, %arg2: memref<240x384xf32, #tpu.memory_space<vmem>>, %arg3: memref<248x128xf32, #tpu.memory_space<vmem>>, %arg4: memref<8x128xf32, #tpu.memory_space<vmem>>) attributes {dimension_semantics = [#tpu.dimension_semantics<arbitrary>], iteration_bounds = array<i64: 1>, scalar_prefetch = 0 : i64, scratch_operands = 0 : i64, tpu.core_type = #tpu.core_type<tc>, window_params = [{pipeline_mode = #tpu.pipeline_mode<synchronous>, transform_indices = @transform_0, window_bounds = array<i64: 14, 112>}, {pipeline_mode = #tpu.pipeline_mode<synchronous>, transform_indices = @transform_1, window_bounds = array<i64: 240, 384>}, {pipeline_mode = #tpu.pipeline_mode<synchronous>, transform_indices = @transform_2, window_bounds = array<i64: 248, 128>}, {pipeline_mode = #tpu.pipeline_mode<synchronous>, transform_indices = @transform_3, window_bounds = array<i64: 8, 128>}]} {
    %c208 = arith.constant 208 : index
    %c0 = arith.constant 0 : index
    %0 = vector.load %arg3[%c208, %c0] : memref<248x128xf32, #tpu.memory_space<vmem>>, vector<14x14xf32>
    %c224 = arith.constant 224 : index
    %c0_0 = arith.constant 0 : index
    %1 = vector.load %arg3[%c224, %c0_0] : memref<248x128xf32, #tpu.memory_space<vmem>>, vector<14x14xf32>
    %c240 = arith.constant 240 : index
    %c0_1 = arith.constant 0 : index
    %2 = vector.load %arg3[%c240, %c0_1] : memref<248x128xf32, #tpu.memory_space<vmem>>, vector<8x128xf32>
    %c0_2 = arith.constant 0 : index
    %c0_3 = arith.constant 0 : index
    %3 = vector.load %arg1[%c0_2, %c0_3] : memref<14x112xf32, #tpu.memory_space<vmem>>, vector<14x112xf32>
    %c0_4 = arith.constant 0 : index
    %c0_5 = arith.constant 0 : index
    %4 = vector.load %arg2[%c0_4, %c0_5] : memref<240x384xf32, #tpu.memory_space<vmem>>, vector<112x384xf32>
    %cst = arith.constant dense<0.000000e+00> : vector<14x384xf32>
    %5 = tpu.matmul %3, %4, %cst {dimension_numbers = #tpu.dot_dimension_numbers<[1], [0], [0], [1], [0, 0, 1, 1], [], []>} : vector<14x112xf32>, vector<112x384xf32>, vector<14x384xf32> -> vector<14x384xf32>
    %6 = vector.extract_strided_slice %5 {offsets = [0, 0], sizes = [14, 128], strides = [1, 1]} : vector<14x384xf32> to vector<14x128xf32>
    %7 = vector.extract_strided_slice %5 {offsets = [0, 128], sizes = [14, 128], strides = [1, 1]} : vector<14x384xf32> to vector<14x128xf32>
    %cst_6 = arith.constant dense<0.000000e+00> : vector<14x128xf32>
    %8 = tpu.matmul %0, %7, %cst_6 {dimension_numbers = #tpu.dot_dimension_numbers<[1], [0], [0], [1], [0, 0, 1, 1], [], []>} : vector<14x14xf32>, vector<14x128xf32>, vector<14x128xf32> -> vector<14x128xf32>
    %9 = arith.addf %6, %8 : vector<14x128xf32>
    %10 = vector.extract_strided_slice %5 {offsets = [0, 256], sizes = [14, 128], strides = [1, 1]} : vector<14x384xf32> to vector<14x128xf32>
    %cst_7 = arith.constant dense<0.000000e+00> : vector<14x128xf32>
    %11 = tpu.matmul %1, %10, %cst_7 {dimension_numbers = #tpu.dot_dimension_numbers<[1], [0], [0], [1], [0, 0, 1, 1], [], []>} : vector<14x14xf32>, vector<14x128xf32>, vector<14x128xf32> -> vector<14x128xf32>
    %12 = arith.addf %9, %11 : vector<14x128xf32>
    %13 = vector.extract_strided_slice %2 {offsets = [0, 0], sizes = [1, 128], strides = [1, 1]} : vector<8x128xf32> to vector<1x128xf32>
    %14 = vector.broadcast %13 : vector<1x128xf32> to vector<14x128xf32>
    %15 = arith.addf %12, %14 : vector<14x128xf32>
    %cst_8 = arith.constant 0.000000e+00 : f32
    %16 = vector.broadcast %cst_8 : f32 to vector<14x128xf32>
    %17 = arith.maximumf %15, %16 : vector<14x128xf32>
    %c112 = arith.constant 112 : index
    %c0_9 = arith.constant 0 : index
    %18 = vector.load %arg2[%c112, %c0_9] : memref<240x384xf32, #tpu.memory_space<vmem>>, vector<128x384xf32>
    %cst_10 = arith.constant dense<0.000000e+00> : vector<14x384xf32>
    %19 = tpu.matmul %17, %18, %cst_10 {dimension_numbers = #tpu.dot_dimension_numbers<[1], [0], [0], [1], [0, 0, 1, 1], [], []>} : vector<14x128xf32>, vector<128x384xf32>, vector<14x384xf32> -> vector<14x384xf32>
    %20 = vector.extract_strided_slice %19 {offsets = [0, 0], sizes = [14, 128], strides = [1, 1]} : vector<14x384xf32> to vector<14x128xf32>
    %21 = vector.extract_strided_slice %19 {offsets = [0, 128], sizes = [14, 128], strides = [1, 1]} : vector<14x384xf32> to vector<14x128xf32>
    %cst_11 = arith.constant dense<0.000000e+00> : vector<14x128xf32>
    %22 = tpu.matmul %0, %21, %cst_11 {dimension_numbers = #tpu.dot_dimension_numbers<[1], [0], [0], [1], [0, 0, 1, 1], [], []>} : vector<14x14xf32>, vector<14x128xf32>, vector<14x128xf32> -> vector<14x128xf32>
    %23 = arith.addf %20, %22 : vector<14x128xf32>
    %24 = vector.extract_strided_slice %19 {offsets = [0, 256], sizes = [14, 128], strides = [1, 1]} : vector<14x384xf32> to vector<14x128xf32>
    %cst_12 = arith.constant dense<0.000000e+00> : vector<14x128xf32>
    %25 = tpu.matmul %1, %24, %cst_12 {dimension_numbers = #tpu.dot_dimension_numbers<[1], [0], [0], [1], [0, 0, 1, 1], [], []>} : vector<14x14xf32>, vector<14x128xf32>, vector<14x128xf32> -> vector<14x128xf32>
    %26 = arith.addf %23, %25 : vector<14x128xf32>
    %27 = vector.extract_strided_slice %2 {offsets = [1, 0], sizes = [1, 128], strides = [1, 1]} : vector<8x128xf32> to vector<1x128xf32>
    %28 = vector.broadcast %27 : vector<1x128xf32> to vector<14x128xf32>
    %29 = arith.addf %26, %28 : vector<14x128xf32>
    %cst_13 = arith.constant 0.000000e+00 : f32
    %30 = vector.broadcast %cst_13 : f32 to vector<14x128xf32>
    %31 = arith.maximumf %29, %30 : vector<14x128xf32>
    %c0_14 = arith.constant 0 : index
    %c0_15 = arith.constant 0 : index
    %32 = vector.load %arg3[%c0_14, %c0_15] : memref<248x128xf32, #tpu.memory_space<vmem>>, vector<128x56xf32>
    %cst_16 = arith.constant dense<0.000000e+00> : vector<14x56xf32>
    %33 = tpu.matmul %31, %32, %cst_16 {dimension_numbers = #tpu.dot_dimension_numbers<[1], [0], [0], [1], [0, 0, 1, 1], [], []>} : vector<14x128xf32>, vector<128x56xf32>, vector<14x56xf32> -> vector<14x56xf32>
    %c184 = arith.constant 184 : index
    %c0_17 = arith.constant 0 : index
    %34 = vector.load %arg3[%c184, %c0_17] : memref<248x128xf32, #tpu.memory_space<vmem>>, vector<14x56xf32>
    %35 = arith.mulf %33, %34 : vector<14x56xf32>
    %c128 = arith.constant 128 : index
    %c0_18 = arith.constant 0 : index
    %36 = vector.load %arg3[%c128, %c0_18] : memref<248x128xf32, #tpu.memory_space<vmem>>, vector<56x128xf32>
    %cst_19 = arith.constant dense<0.000000e+00> : vector<14x128xf32>
    %37 = tpu.matmul %35, %36, %cst_19 {dimension_numbers = #tpu.dot_dimension_numbers<[1], [0], [0], [1], [0, 0, 1, 1], [], []>} : vector<14x56xf32>, vector<56x128xf32>, vector<14x128xf32> -> vector<14x128xf32>
    %c200 = arith.constant 200 : index
    %c0_20 = arith.constant 0 : index
    %38 = vector.load %arg3[%c200, %c0_20] : memref<248x128xf32, #tpu.memory_space<vmem>>, vector<8x14xf32>
    %cst_21 = arith.constant dense<0.000000e+00> : vector<8x128xf32>
    %39 = tpu.matmul %38, %37, %cst_21 {dimension_numbers = #tpu.dot_dimension_numbers<[1], [0], [0], [1], [0, 0, 1, 1], [], []>} : vector<8x14xf32>, vector<14x128xf32>, vector<8x128xf32> -> vector<8x128xf32>
    %40 = vector.extract_strided_slice %2 {offsets = [2, 0], sizes = [1, 128], strides = [1, 1]} : vector<8x128xf32> to vector<1x128xf32>
    %41 = vector.broadcast %40 : vector<1x128xf32> to vector<8x128xf32>
    %42 = arith.addf %39, %41 : vector<8x128xf32>
    %c0_22 = arith.constant 0 : index
    %c0_23 = arith.constant 0 : index
    %43 = vector.load %arg4[%c0_22, %c0_23] : memref<8x128xf32, #tpu.memory_space<vmem>>, vector<8x128xf32>
    tpu.vector_store %arg4[%c0_22, %c0_23], %42 {strides = array<i32>} : memref<8x128xf32, #tpu.memory_space<vmem>>, vector<8x128xf32>,
    return
  }
  func.func @transform_0(%arg0: i32) -> (i32, i32) {
    %c0_i32 = arith.constant 0 : i32
    %c0_i32_0 = arith.constant 0 : i32
    %c0_i32_1 = arith.constant 0 : i32
    return %c0_i32, %c0_i32_0 : i32, i32
  }
  func.func @transform_1(%arg0: i32) -> (i32, i32) {
    %c0_i32 = arith.constant 0 : i32
    %c0_i32_0 = arith.constant 0 : i32
    %c0_i32_1 = arith.constant 0 : i32
    return %c0_i32, %c0_i32_0 : i32, i32
  }
  func.func @transform_2(%arg0: i32) -> (i32, i32) {
    %c0_i32 = arith.constant 0 : i32
    %c0_i32_0 = arith.constant 0 : i32
    %c0_i32_1 = arith.constant 0 : i32
    return %c0_i32, %c0_i32_0 : i32, i32
  }
  func.func @transform_3(%arg0: i32) -> (i32, i32) {
    %c0_i32 = arith.constant 0 : i32
    %c0_i32_0 = arith.constant 0 : i32
    %c0_i32_1 = arith.constant 0 : i32
    return %c0_i32, %c0_i32_0 : i32, i32
  }
}

</mosaic_0001>

<bundles_post_ra>
// kernel: encoder_forward.1
= control target key start
LH: loop header
LB: loop body
LE: loop exit
PB: predicated region body
PF: predicated region fallthrough
CT: control target
= control target key end

     0   :  { %8 = vsyncpa [#allocation3], 0  ;;  %s701_s0 = inlined_call_operand.vmem [shape: f32[14,112], index: 0, kind: input, shape index: {}]   ;;  %s702_s1 = inlined_call_operand.hbm [shape: f32[240,384], index: 1, kind: input, shape index: {}]   ;;  %s703_s2 = inlined_call_operand.hbm [shape: f32[248,128], index: 2, kind: input, shape index: {}]   ;;  %s704_s3 = inlined_call_operand.vmem [shape: f32[8,128], index: 3, kind: output, shape index: {}]  }
   0x1   :  { %s16_s14 = sshll.u32 %s702_s1, 4  ;;  %s17_s14 = int_to_ptr.hbm [resolvable:$true] %s16_s14 }
   0x2   :  { %9 = vsyncpa [#allocation5], 0  ;;  %s619_s15 = smov [#allocation2]   ;;  %s29_s19 = sshll.u32 %s703_s2, 4  ;;  %s30_s19 = int_to_ptr.hbm [resolvable:$true] %s29_s19 }
   0x3   :  { %s18_s16 = sshll.u32 %s619_s15, 4  ;;  %s620_s20 = smov 384   ;;  %s19_s16 = int_to_ptr.vmem [resolvable:$true] %s18_s16 }
   0x4   :  { %s621_s21 = smov 24   ;;  %s622_s22 = smov [#allocation4]  }
   0x5   :  { %24 = dma.hbm_to_vmem [thread:$0]  %s17_s14, 11520, %s19_s16, [#allocation3], %s620_s20, %s620_s20, %s621_s21  }
   0x6   :  { %s31_s23 = sshll.u32 %s622_s22, 4  ;;  %s623_s24 = smov 128   ;;  %s32_s23 = int_to_ptr.vmem [resolvable:$true] %s31_s23 }
   0x7   :  { %s624_s25 = smov 8  }
   0x8   :  { %37 = dma.hbm_to_vmem [thread:$0]  %s30_s19, 3968, %s32_s23, [#allocation5], %s623_s24, %s623_s24, %s624_s25  }
   0x9   :  { %615 = dma.done.wait [#allocation3], 11520  }
   0xa   :  { %616 = vsyncadd [#allocation3], 4294955776 }
   0xb   :  { %617 = dma.done.wait [#allocation5], 3968  }
   0xc   :  { %618 = vsyncadd [#allocation5], 4294963328  ;;  %v93_v0 = vld [vmem:[#allocation2 + $0x140] sm:$0xff]  ;;  %v94_v1 = vld [vmem:[#allocation2 + $0x148] sm:$0xff]  ;;  %vm95_vm0 = vcmask 916480   ;;  %vm178_vm1 = vcmask 1045504  }
   0xd   :  { %v90_v2 = vld [vmem:[#allocation2 + $0x128] sm:$0xff]  ;;  %127 = vmatpush.msra.mxu1 %v93_v0  ;;  %150 = vmatpush.msra.mxu2 %v94_v1  ;;  %v91_v3 = vld [vmem:[#allocation2 + $0x130] sm:$0xff]  ;;  %v88_v5 = vld [vmem:[#allocation2 + $0x118] sm:$0xff]  ;;  %vm171_vm2 = vcmask 113664   ;;  %vm474_vm3 = vcmask 457728  }
   0xe   :  { %v87_v4 = vld [vmem:[#allocation2 + $0x110] sm:$0xff]  ;;  %v84_v6 = vld [vmem:[#allocation2 + $0xf8] sm:$0xff]  ;;  %v85_v7 = vld [vmem:[#allocation2 + $0x100] sm:$0xff] }
   0xf   :  { %128 = vmatpush.msra.mxu1 %v90_v2  ;;  %151 = vmatpush.msra.mxu2 %v91_v3  ;;  %v81_v8 = vld [vmem:[#allocation2 + $0xe0] sm:$0xff]  ;;  %v82_v9 = vld [vmem:[#allocation2 + $0xe8] sm:$0xff]  ;;  %v79_v11 = vld [vmem:[#allocation2 + $0xd0] sm:$0xff] }
  0x10   :  { %v78_v10 = vld [vmem:[#allocation2 + $0xc8] sm:$0xff]  ;;  %v75_v12 = vld [vmem:[#allocation2 + $0xb0] sm:$0xff]  ;;  %v76_v13 = vld [vmem:[#allocation2 + $0xb8] sm:$0xff] }
  0x11   :  { %129 = vmatpush.msra.mxu1 %v87_v4  ;;  %152 = vmatpush.msra.mxu2 %v88_v5  ;;  %v92_v14 = vld [vmem:[#allocation2 + $0x138] sm:$0xff]  ;;  %v89_v15 = vld [vmem:[#allocation2 + $0x120] sm:$0xff]  ;;  %v86_v18 = vld [vmem:[#allocation2 + $0x108] sm:$0xff] }
  0x12   :  { %v72_v16 = vld [vmem:[#allocation2 + $0x98] sm:$0xff]  ;;  %v73_v17 = vld [vmem:[#allocation2 + $0xa0] sm:$0xff]  ;;  %104 = vmatpush.msra.mxu0 %v92_v14  ;;  %v70_v20 = vld [vmem:[#allocation2 + $0x88] sm:$0xff] }
  0x13   :  { %130 = vmatpush.msra.mxu1 %v84_v6  ;;  %153 = vmatpush.msra.mxu2 %v85_v7  ;;  %v69_v19 = vld [vmem:[#allocation2 + $0x80] sm:$0xff]  ;;  %v66_v21 = vld [vmem:[#allocation2 + $0x68] sm:$0xff]  ;;  %v67_v22 = vld [vmem:[#allocation2 + $0x70] sm:$0xff] }
  0x14   :  { %105 = vmatpush.msra.mxu0 %v89_v15  ;;  %v63_v23 = vld [vmem:[#allocation2 + $0x50] sm:$0xff]  ;;  %v64_v24 = vld [vmem:[#allocation2 + $0x58] sm:$0xff]  ;;  %v61_v26 = vld [vmem:[#allocation2 + $0x40] sm:$0xff] }
  0x15   :  { %131 = vmatpush.msra.mxu1 %v81_v8  ;;  %154 = vmatpush.msra.mxu2 %v82_v9  ;;  %v60_v25 = vld [vmem:[#allocation2 + $0x38] sm:$0xff]  ;;  %v57_v27 = vld [vmem:[#allocation2 + $0x20] sm:$0xff]  ;;  %v58_v28 = vld [vmem:[#allocation2 + $0x28] sm:$0xff] }
  0x16   :  { %106 = vmatpush.msra.mxu0 %v86_v18  ;;  %v54_v29 = vld [vmem:[#allocation2 + $0x8] sm:$0xff]  ;;  %v55_v30 = vld [vmem:[#allocation2 + $0x10] sm:$0xff]  ;;  %v51_v31 = vld [vmem:[%s701_s0] sm:$0xff] }
  0x17   :  { %132 = vmatpush.msra.mxu1 %v78_v10  ;;  %155 = vmatpush.msra.mxu2 %v79_v11  ;;  %v52_v32 = vld [vmem:[%s701_s0 + $0x8] sm:$0x3f]  ;;  %v83_v33 = vld [vmem:[#allocation2 + $0xf0] sm:$0xff]  ;;  %v80_v34 = vld [vmem:[#allocation2 + $0xd8] sm:$0xff] }
  0x18   :  { %107 = vmatpush.msra.mxu0 %v83_v33  ;;  %v77_v35 = vld [vmem:[#allocation2 + $0xc0] sm:$0xff]  ;;  %v74_v36 = vld [vmem:[#allocation2 + $0xa8] sm:$0xff]  ;;  %v71_v37 = vld [vmem:[#allocation2 + $0x90] sm:$0xff] }
  0x19   :  { %133 = vmatpush.msra.mxu1 %v75_v12  ;;  %156 = vmatpush.msra.mxu2 %v76_v13  ;;  %v68_v38 = vld [vmem:[#allocation2 + $0x78] sm:$0xff]  ;;  %v65_v39 = vld [vmem:[#allocation2 + $0x60] sm:$0xff]  ;;  %v62_v40 = vld [vmem:[#allocation2 + $0x48] sm:$0xff] }
  0x1a   :  { %108 = vmatpush.msra.mxu0 %v80_v34  ;;  %v59_v41 = vld [vmem:[#allocation2 + $0x30] sm:$0xff]  ;;  %v56_v42 = vld [vmem:[#allocation2 + $0x18] sm:$0xff]  ;;  %v53_v43 = vld [vmem:[#allocation2] sm:$0xff] }
  0x1b   :  { %134 = vmatpush.msra.mxu1 %v72_v16  ;;  %157 = vmatpush.msra.mxu2 %v73_v17  ;;  %v292_v44 = vld [vmem:[#allocation2 + $0x2c0] sm:$0xff]  ;;  %v293_v45 = vld [vmem:[#allocation2 + $0x2c8] sm:$0xff]  ;;  %v290_v47 = vld [vmem:[#allocation2 + $0x2b0] sm:$0xff] }
  0x1c   :  { %109 = vmatpush.msra.mxu0 %v77_v35  ;;  %v289_v46 = vld [vmem:[#allocation2 + $0x2a8] sm:$0xff]  ;;  %v286_v48 = vld [vmem:[#allocation2 + $0x290] sm:$0xff]  ;;  %v287_v49 = vld [vmem:[#allocation2 + $0x298] sm:$0xff] }
  0x1d   :  { %135 = vmatpush.msra.mxu1 %v69_v19  ;;  %158 = vmatpush.msra.mxu2 %v70_v20  ;;  %v283_v50 = vld [vmem:[#allocation2 + $0x278] sm:$0xff]  ;;  %v284_v51 = vld [vmem:[#allocation2 + $0x280] sm:$0xff]  ;;  %v281_v54 = vld [vmem:[#allocation2 + $0x268] sm:$0xff] }
  0x1e   :  { %110 = vmatpush.msra.mxu0 %v74_v36  ;;  %v280_v53 = vld [vmem:[#allocation2 + $0x260] sm:$0xff]  ;;  %v277_v55 = vld [vmem:[#allocation2 + $0x248] sm:$0xff]  ;;  %v278_v56 = vld [vmem:[#allocation2 + $0x250] sm:$0xff] }
  0x1f   :  { %136 = vmatpush.msra.mxu1 %v66_v21  ;;  %159 = vmatpush.msra.mxu2 %v67_v22  ;;  %v274_v57 = vld [vmem:[#allocation2 + $0x230] sm:$0xff]  ;;  %v275_v58 = vld [vmem:[#allocation2 + $0x238] sm:$0xff]  ;;  %v272_v61 = vld [vmem:[#allocation2 + $0x220] sm:$0xff] }
  0x20   :  { %111 = vmatpush.msra.mxu0 %v71_v37  ;;  %v271_v60 = vld [vmem:[#allocation2 + $0x218] sm:$0xff]  ;;  %v268_v63 = vld [vmem:[#allocation2 + $0x200] sm:$0xff]  ;;  %v269_v1 = vld [vmem:[#allocation2 + $0x208] sm:$0xff] }
  0x21   :  { %137 = vmatpush.msra.mxu1 %v63_v23  ;;  %160 = vmatpush.msra.mxu2 %v64_v24  ;;  %v664_v0 = vld [vmem:[#allocation4 + $0xd0] sm:$0xff]  ;;  %v265_v2 = vld [vmem:[#allocation2 + $0x1e8] sm:$0xff]  ;;  %v266_v3 = vld [vmem:[#allocation2 + $0x1f0] sm:$0xff] }
  0x22   :  { %112 = vmatpush.msra.mxu0 %v68_v38  ;;  %v262_v4 = vld [vmem:[#allocation2 + $0x1d0] sm:$0xff]  ;;  %v263_v5 = vld [vmem:[#allocation2 + $0x1d8] sm:$0xff]  ;;  %v671_v9 = vld [vmem:[#allocation4 + $0xd8] sm:$0x3f] }
  0x23   :  { %138 = vmatpush.msra.mxu1 %v60_v25  ;;  %161 = vmatpush.msra.mxu2 %v61_v26  ;;  %v669_v7 = vld [vmem:[#allocation4 + $0xe0] sm:$0xff]  ;;  %v291_v8 = vld [vmem:[#allocation2 + $0x2b8] sm:$0xff]  ;;  %v288_v10 = vld [vmem:[#allocation2 + $0x2a0] sm:$0xff] }
  0x24   :  { %113 = vmatpush.msra.mxu0 %v65_v39  ;;  %v285_v11 = vld [vmem:[#allocation2 + $0x288] sm:$0xff]  ;;  %v282_v12 = vld [vmem:[#allocation2 + $0x270] sm:$0xff]  ;;  %v677_v13 = vld [vmem:[#allocation4 + $0xe8] sm:$0x3f] }
  0x25   :  { %139 = vmatpush.msra.mxu1 %v57_v27  ;;  %162 = vmatpush.msra.mxu2 %v58_v28  ;;  %v279_v14 = vld [vmem:[#allocation2 + $0x258] sm:$0xff]  ;;  %v276_v15 = vld [vmem:[#allocation2 + $0x240] sm:$0xff]  ;;  %v273_v16 = vld [vmem:[#allocation2 + $0x228] sm:$0xff] }
  0x26   :  { %114 = vmatpush.msra.mxu0 %v62_v40  ;;  %v270_v17 = vld [vmem:[#allocation2 + $0x210] sm:$0xff]  ;;  %v267_v18 = vld [vmem:[#allocation2 + $0x1f8] sm:$0xff]  ;;  %v264_v19 = vld [vmem:[#allocation2 + $0x1e0] sm:$0xff] }
  0x27   :  { %140 = vmatpush.msra.mxu1 %v54_v29  ;;  %163 = vmatpush.msra.mxu2 %v55_v30  ;;  %v261_v20 = vld [vmem:[#allocation2 + $0x1c8] sm:$0xff]  ;;  %v258_v21 = vld [vmem:[#allocation2 + $0x1b0] sm:$0xff]  ;;  %v259_v22 = vld [vmem:[#allocation2 + $0x1b8] sm:$0xff] }
  0x28   :  { %541 = vmatmul.msk.f32.vlgmr.msra.gmra.mxu1 %vm95_vm0, %v51_v31  ;;  %543 = vmatmul.msk.f32.vlgmr.msra.gmra.mxu2 %vm95_vm0, %v51_v31  ;;  %v260_v23 = vld [vmem:[#allocation2 + $0x1c0] sm:$0xff]  ;;  %v255_v24 = vld [vmem:[#allocation2 + $0x198] sm:$0xff]  ;;  %v257_v26 = vld [vmem:[#allocation2 + $0x1a8] sm:$0xff] }
  0x29   :  { %115 = vmatpush.msra.mxu0 %v59_v41  ;;  %340 = vmatpush.msrb.mxu1 %v293_v45  ;;  %v256_v25 = vld [vmem:[#allocation2 + $0x1a0] sm:$0xff]  ;;  %v253_v28 = vld [vmem:[#allocation2 + $0x188] sm:$0xff]  ;;  %v254_v29 = vld [vmem:[#allocation2 + $0x190] sm:$0xff] }
  0x2a   :  { %v252_v27 = vld [vmem:[#allocation2 + $0x180] sm:$0xff]  ;;  %v249_v30 = vld [vmem:[#allocation2 + $0x168] sm:$0xff]  ;;  %v246_v33 = vld [vmem:[#allocation2 + $0x150] sm:$0xff] }
  0x2b   :  { %116 = vmatpush.msra.mxu0 %v56_v42  ;;  %341 = vmatpush.msrb.mxu1 %v290_v47  ;;  %v247_v34 = vld [vmem:[#allocation2 + $0x158] sm:$0xff]  ;;  %v248_v35 = vld [vmem:[#allocation2 + $0x160] sm:$0xff] }
  0x2c   :  { %v681_v38 = vld [vmem:[#allocation4 + $0xf0] sm:$0xff] }
  0x2d   :  { %117 = vmatpush.msra.mxu0 %v53_v43  ;;  %342 = vmatpush.msrb.mxu1 %v287_v49  ;;  %v241_v40 = vperm.slane %v681_v38, 0 }
  0x2e   :  { %539 = vmatmul.msk.f32.vlgmr.msra.gmra.mxu0 %vm95_vm0, %v51_v31  ;;  %v250_v31 = vld [vmem:[#allocation2 + $0x170] sm:$0xff] }
  0x2f   :  { %317 = vmatpush.msrb.mxu0 %v292_v44  ;;  %343 = vmatpush.msrb.mxu1 %v284_v51 }
  0x30   :  { %542 = vmatmul.msk.f32.gmra.mxu1 %vm95_vm0, %v52_v32  ;;  %544 = vmatmul.msk.f32.gmra.mxu2 %vm95_vm0, %v52_v32 }
  0x31   :  { %318 = vmatpush.msrb.mxu0 %v289_v46  ;;  %344 = vmatpush.msrb.mxu1 %v281_v54  ;;  %v439_v54 = vld [vmem:[#allocation4 + $0x78] sm:$0xff] }
  0x33   :  { %319 = vmatpush.msrb.mxu0 %v286_v48  ;;  %345 = vmatpush.msrb.mxu1 %v278_v56  ;;  %v437_v56 = vld [vmem:[#allocation4 + $0x68] sm:$0xff] }
  0x35   :  { %320 = vmatpush.msrb.mxu0 %v283_v50  ;;  %346 = vmatpush.msrb.mxu1 %v275_v58  ;;  %v436_v58 = vld [vmem:[#allocation4 + $0x60] sm:$0xff] }
  0x36   :  { %540 = vmatmul.msk.f32.gmra.mxu0 %vm95_vm0, %v52_v32  ;;  %v251_v32 = vld [vmem:[#allocation2 + $0x178] sm:$0xff] }
  0x37   :  { %321 = vmatpush.msrb.mxu0 %v280_v53  ;;  %347 = vmatpush.msrb.mxu1 %v272_v61  ;;  %v434_v61 = vld [vmem:[#allocation4 + $0x50] sm:$0xff] }
  0x39   :  { %322 = vmatpush.msrb.mxu0 %v277_v55  ;;  %348 = vmatpush.msrb.mxu1 %v269_v1  ;;  %v438_v55 = vld [vmem:[#allocation4 + $0x70] sm:$0xff] }
  0x3a   :  { %v430_v1 = vld [vmem:[#allocation4 + $0x30] sm:$0xff] }
  0x3b   :  { %323 = vmatpush.msrb.mxu0 %v274_v57  ;;  %349 = vmatpush.msrb.mxu1 %v266_v3  ;;  %v428_v3 = vld [vmem:[#allocation4 + $0x20] sm:$0xff] }
  0x3d   :  { %324 = vmatpush.msrb.mxu0 %v271_v60  ;;  %350 = vmatpush.msrb.mxu1 %v263_v5  ;;  %v435_v60 = vld [vmem:[#allocation4 + $0x58] sm:$0xff]  ;;  %v426_v5 = vld [vmem:[#allocation4 + $0x10] sm:$0xff] }
  0x3f   :  { %325 = vmatpush.msrb.mxu0 %v268_v63  ;;  %351 = vmatpush.msrb.mxu1 %v260_v23  ;;  %v432_v63 = vld [vmem:[#allocation4 + $0x40] sm:$0xff] }
  0x41   :  { %326 = vmatpush.msrb.mxu0 %v265_v2  ;;  %352 = vmatpush.msrb.mxu1 %v257_v26  ;;  %v429_v2 = vld [vmem:[#allocation4 + $0x28] sm:$0xff] }
  0x43   :  { %327 = vmatpush.msrb.mxu0 %v262_v4  ;;  %353 = vmatpush.msrb.mxu1 %v254_v29  ;;  %v427_v4 = vld [vmem:[#allocation4 + $0x18] sm:$0xff]  ;;  %v467_v29 = vld [vmem:[#allocation4 + $0x80] sm:$0xff] }
  0x45   :  { %328 = vmatpush.msrb.mxu0 %v259_v22  ;;  %354 = vmatpush.msrb.mxu1 %v251_v32 }
  0x47   :  { %329 = vmatpush.msrb.mxu0 %v256_v25  ;;  %355 = vmatpush.msrb.mxu1 %v248_v35 }
  0x49   :  { %330 = vmatpush.msrb.mxu0 %v253_v28  ;;  %v468_v28 = vld [vmem:[#allocation4 + $0x88] sm:$0xff] }
  0x4b   :  { %331 = vmatpush.msrb.mxu0 %v250_v31 }
  0x4d   :  { %332 = vmatpush.msrb.mxu0 %v247_v34 }
  0xa5   :  { %v142_v52 = vpop.f32.mrf.mxu1 }
  0xab   :  { %v165_v59 = vpop.f32.mrf.mxu2  ;;  %v119_v36 = vpop.f32.mrf.mxu0 }
  0xad   :  { %v145_v62 = vpop.f32.mrf.mxu1 }
  0xae   :  { %545 = vmatpush.msk.msrb.mxu2 %vm178_vm1, %v145_v62  ;;  %v433_v62 = vld [vmem:[#allocation4 + $0x48] sm:$0xff] }
  0xb0   :  { %197 = vmatpush.msrb.mxu2 %v142_v52 }
  0xb1   :  { %546 = vmatmul.msk.f32.vlgmr.msrb.gmra.mxu2 %vm171_vm2, %v664_v0 }
  0xb3   :  { %v168_v6 = vpop.f32.mrf.mxu2  ;;  %v122_v43 = vpop.f32.mrf.mxu0 }
  0xb4   :  { %548 = vmatpush.msk.msra.mxu3 %vm178_vm1, %v168_v6  ;;  %v425_v6 = vld [vmem:[#allocation4 + $0x8] sm:$0xff] }
  0xb6   :  { %231 = vmatpush.msra.mxu3 %v165_v59 }
  0xb7   :  { %549 = vmatmul.msk.f32.vlgmr.msra.gmra.mxu3 %vm171_vm2, %v669_v7 }
  0xb8   :  { %294 = vmatpush.msrb.mxu3 %v291_v8  ;;  %v473_v8 = vld [vmem:[#allocation4 + $0xb0] sm:$0xff] }
  0xb9   :  { %547 = vmatmul.msk.f32.gmra.mxu2 %vm171_vm2, %v671_v9  ;;  %490 = vmatpush.msra.mxu0 %v473_v8 }
  0xba   :  { %295 = vmatpush.msrb.mxu3 %v288_v10 }
  0xbc   :  { %296 = vmatpush.msrb.mxu3 %v285_v11  ;;  %v471_v11 = vld [vmem:[#allocation4 + $0xa0] sm:$0xff] }
  0xbe   :  { %297 = vmatpush.msrb.mxu3 %v282_v12  ;;  %v470_v12 = vld [vmem:[#allocation4 + $0x98] sm:$0xff] }
  0xbf   :  { %550 = vmatmul.msk.f32.gmra.mxu3 %vm171_vm2, %v677_v13 }
  0xc0   :  { %298 = vmatpush.msrb.mxu3 %v279_v14 }
  0xc2   :  { %299 = vmatpush.msrb.mxu3 %v276_v15 }
  0xc4   :  { %300 = vmatpush.msrb.mxu3 %v273_v16 }
  0xc6   :  { %301 = vmatpush.msrb.mxu3 %v270_v17  ;;  %v419_v17 = vperm.slane %v681_v38, 1 }
  0xc8   :  { %302 = vmatpush.msrb.mxu3 %v267_v18 }
  0xca   :  { %303 = vmatpush.msrb.mxu3 %v264_v19 }
  0xcc   :  { %304 = vmatpush.msrb.mxu3 %v261_v20 }
  0xce   :  { %305 = vmatpush.msrb.mxu3 %v258_v21 }
  0xd0   :  { %306 = vmatpush.msrb.mxu3 %v255_v24 }
  0xd2   :  { %307 = vmatpush.msrb.mxu3 %v252_v27 }
  0xd4   :  { %308 = vmatpush.msrb.mxu3 %v249_v30  ;;  %v463_v30 = vld [vmem:[#allocation4 + $0xb8] sm:$0xff] }
  0xd6   :  { %309 = vmatpush.msrb.mxu3 %v246_v33  ;;  %v464_v33 = vld [vmem:[#allocation4 + $0xc0] sm:$0x3f] }
  0xd8   :  { %440 = vmatpush.msra.mxu3 %v439_v54 }
  0xda   :  { %441 = vmatpush.msra.mxu3 %v438_v55 }
  0xdc   :  { %442 = vmatpush.msra.mxu3 %v437_v56 }
  0xde   :  { %443 = vmatpush.msra.mxu3 %v436_v58 }
  0xe0   :  { %444 = vmatpush.msra.mxu3 %v435_v60 }
  0xe2   :  { %445 = vmatpush.msra.mxu3 %v434_v61 }
  0xe4   :  { %446 = vmatpush.msra.mxu3 %v433_v62 }
  0xe6   :  { %447 = vmatpush.msra.mxu3 %v432_v63 }
 0x134   :  { %v199_v37 = vpop.f32.mrf.mxu2 }
 0x135   :  { %v205_v39 = vadd.f32 %v199_v37, %v119_v36 }
 0x13a   :  { %v233_v41 = vpop.f32.mrf.mxu3 }
 0x13b   :  { %v239_v42 = vadd.f32 %v233_v41, %v205_v39  ;;  %v504_v39 = vld [vmem:[#allocation4 + $0xc8] sm:$0xff] }
 0x13c   :  { %v202_v44 = vpop.f32.mrf.mxu2 }
 0x13d   :  { %v242_v45 = vadd.f32 %v241_v40, %v239_v42  ;;  %v206_v47 = vadd.f32 %v202_v44, %v122_v43 }
 0x13f   :  { %v244_v46 = vmax.f32 %v242_v45, 0.0 }
 0x141   :  { %310 = vmatmul.f32.vlgmr.msrb.gmra.mxu3 %v244_v46  ;;  %333 = vmatmul.f32.vlgmr.msrb.gmra.mxu0 %v244_v46 }
 0x142   :  { %356 = vmatmul.f32.vlgmr.msrb.gmra.mxu1 %v244_v46  ;;  %v236_v48 = vpop.f32.mrf.mxu3 }
 0x143   :  { %v240_v49 = vadd.f32 %v236_v48, %v206_v47 }
 0x145   :  { %v243_v50 = vadd.f32 %v241_v40, %v240_v49  ;;  %v505_v40 = vperm.slane %v681_v38, 2 }
 0x147   :  { %v245_v51 = vmax.f32 %v243_v50, 0.0 }
 0x149   :  { %313 = vmatmul.f32.gmra.mxu3 %v245_v51  ;;  %336 = vmatmul.f32.gmra.mxu0 %v245_v51 }
 0x14a   :  { %359 = vmatmul.f32.gmra.mxu1 %v245_v51 }
 0x1be   :  { %v334_v52 = vpop.f32.mrf.mxu0 }
 0x1bf   :  { %v357_v53 = vpop.f32.mrf.mxu1 }
 0x1c4   :  { %v311_v15 = vpop.f32.mrf.mxu3 }
 0x1c6   :  { %v337_v57 = vpop.f32.mrf.mxu0 }
 0x1c7   :  { %551 = vmatpush.msk.msra.mxu2 %vm178_vm1, %v337_v57  ;;  %v360_v59 = vpop.f32.mrf.mxu1 }
 0x1c9   :  { %381 = vmatpush.msra.mxu2 %v334_v52 }
 0x1ca   :  { %552 = vmatmul.msk.f32.vlgmr.msra.gmra.mxu2 %vm171_vm2, %v664_v0  ;;  %v431_v0 = vld [vmem:[#allocation4 + $0x38] sm:$0xff] }
 0x1cb   :  { %554 = vmatpush.msk.msrb.mxu2 %vm178_vm1, %v360_v59  ;;  %448 = vmatpush.msra.mxu3 %v431_v0 }
 0x1cc   :  { %v314_v22 = vpop.f32.mrf.mxu3 }
 0x1cd   :  { %409 = vmatpush.msrb.mxu2 %v357_v53  ;;  %449 = vmatpush.msra.mxu3 %v430_v1 }
 0x1cf   :  { %450 = vmatpush.msra.mxu3 %v429_v2 }
 0x1d1   :  { %451 = vmatpush.msra.mxu3 %v428_v3 }
 0x1d2   :  { %553 = vmatmul.msk.f32.gmra.mxu2 %vm171_vm2, %v671_v9  ;;  %v472_v9 = vld [vmem:[#allocation4 + $0xa8] sm:$0xff] }
 0x1d3   :  { %452 = vmatpush.msra.mxu3 %v427_v4  ;;  %491 = vmatpush.msra.mxu0 %v472_v9 }
 0x1d5   :  { %453 = vmatpush.msra.mxu3 %v426_v5  ;;  %492 = vmatpush.msra.mxu0 %v471_v11 }
 0x1d7   :  { %454 = vmatpush.msra.mxu3 %v425_v6  ;;  %493 = vmatpush.msra.mxu0 %v470_v12 }
 0x1da   :  { %555 = vmatmul.msk.f32.vlgmr.msrb.gmra.mxu2 %vm171_vm2, %v669_v7  ;;  %v424_v7 = vld [vmem:[#allocation4] sm:$0xff] }
 0x1db   :  { %455 = vmatpush.msra.mxu3 %v424_v7 }
 0x1e2   :  { %556 = vmatmul.msk.f32.gmra.mxu2 %vm171_vm2, %v677_v13  ;;  %v469_v13 = vld [vmem:[#allocation4 + $0x90] sm:$0xff] }
 0x1e3   :  { %494 = vmatpush.msra.mxu0 %v469_v13 }
 0x1e5   :  { %495 = vmatpush.msra.mxu0 %v468_v28 }
 0x1e7   :  { %496 = vmatpush.msra.mxu0 %v467_v29 }
 0x24d   :  { %v383_v10 = vpop.f32.mrf.mxu2 }
 0x24e   :  { %v389_v16 = vadd.f32 %v383_v10, %v311_v15 }
 0x255   :  { %v386_v14 = vpop.f32.mrf.mxu2 }
 0x256   :  { %v390_v23 = vadd.f32 %v386_v14, %v314_v22 }
 0x25d   :  { %v411_v18 = vpop.f32.mrf.mxu2 }
 0x25e   :  { %v417_v19 = vadd.f32 %v411_v18, %v389_v16 }
 0x260   :  { %v420_v20 = vadd.f32 %v419_v17, %v417_v19 }
 0x262   :  { %v422_v21 = vmax.f32 %v420_v20, 0.0 }
 0x264   :  { %456 = vmatmul.f32.vlgmr.msra.gmra.mxu3 %v422_v21 }
 0x265   :  { %v414_v24 = vpop.f32.mrf.mxu2 }
 0x266   :  { %v418_v25 = vadd.f32 %v414_v24, %v390_v23 }
 0x268   :  { %v421_v26 = vadd.f32 %v419_v17, %v418_v25 }
 0x26a   :  { %v423_v27 = vmax.f32 %v421_v26, 0.0 }
 0x26c   :  { %459 = vmatmul.f32.gmra.mxu3 %v423_v27 }
 0x2e7   :  { %v457_v31 = vpop.f32.mrf.mxu3 }
 0x2e8   :  { %v465_v32 = vmul.f32 %v463_v30, %v457_v31 }
 0x2ea   :  { %557 = vmatmul.msk.f32.vlgmr.msra.gmra.mxu0 %vm474_vm3, %v465_v32 }
 0x2ef   :  { %v460_v34 = vpop.f32.mrf.mxu3 }
 0x2f0   :  { %v466_v35 = vmul.f32 %v464_v33, %v460_v34 }
 0x2f2   :  { %558 = vmatmul.msk.f32.gmra.mxu0 %vm474_vm3, %v466_v35 }
 0x367   :  { %v498_v36 = vpop.f32.mrf.mxu0 }
 0x36f   :  { %v501_v37 = vpop.f32.mrf.mxu0 }
 0x370   :  { %559 = vmatpush.msk.msra.mxu1 %vm178_vm1, %v501_v37 }
 0x372   :  { %527 = vmatpush.msra.mxu1 %v498_v36 }
 0x373   :  { %560 = vmatmul.msk.f32.vlgmr.msra.gmra.mxu1 %vm171_vm2, %v504_v39 }
 0x3f0   :  { %v529_v41 = vpop.f32.mrf.mxu1 }
 0x3f1   :  { %v530_v42 = vadd.f32 %v529_v41, %v505_v40 }
 0x3f3   :  { %532 = vst [vmem:[%s704_s3] sm:$0xff] %v530_v42 }
 0x3f4   :  { %537 = vsyncpa [#allocation3], 1 }
 0x3f5   :  { %538 = vsyncpa [#allocation5], 1 }

</bundles_post_ra>
